<compile_context>
chip_gen: v6e
topology: v6e:2x2x1
jax: 0.10.0
libtpu: 0.0.40
codegen_flags: <defaults>
</compile_context>

<pallas_src>
import math

import jax
import jax.numpy as jnp
from jax.experimental import pallas as pl
from jax.experimental.pallas import tpu as pltpu


def _dd_matmul_kernel(x_ref, k_ref, o_ref):
    # x_ref: (bt, folded_in) lane-dense batch tile
    # k_ref: (folded_in, folded_out) resident block-diagonal kron matrix
    o_ref[...] = jnp.dot(
        x_ref[...], k_ref[...],
        preferred_element_type=jnp.float32).astype(o_ref.dtype)


def total_distribution_decompose_forward(x, weights, *, agent_num, q_num,
                                         batch_tile=2048):
    """out = x @ kron(softmax(weights, 0), eye(q_num)).

    x: (batch, agent_num*q_num), weights: (agent_num, 1).
    batch_tile is measured in *folded* rows (each folded row = `fold` rows).
    """
    batch, input_dim = x.shape
    assert input_dim == agent_num * q_num
    out_dtype = x.dtype

    # ---- hoisted out of the kernel loop: softmax + kron (tiny, once) ----------
    sw = jax.nn.softmax(weights.astype(jnp.float32), axis=0)            # (A, 1)
    kron_small = jnp.kron(sw, jnp.eye(q_num, dtype=jnp.float32))        # (A*q, q)

    # ---- lane-dense row folding (capped so redundancy stays mem-bound) --------
    fold = 128 // math.gcd(q_num, 128)       # fold*q_num = lcm(q_num, 128)
    if fold > 32:
        # awkward q_num (e.g. odd): stay correct, bound redundant FLOPs / kron
        # size; block dims equal the full array dims so alignment still holds.
        fold = 16
    folded_in = fold * input_dim
    folded_out = fold * q_num

    # matmul operand dtype: keep narrow inputs narrow (no wrapper cast of x)
    k_dtype = jnp.float32 if x.dtype == jnp.float32 else x.dtype
    kron_big = jnp.kron(jnp.eye(fold, dtype=jnp.float32),
                        kron_small).astype(k_dtype)                     # block-diag

    # ---- aligned body / tiny tail split (no full-array pad, no out slice) -----
    body_batch = (batch // fold) * fold
    rows = body_batch // fold                 # folded rows handled by the kernel
    tail = batch - body_batch                 # < fold rows, plain JAX

    x_itemsize = jnp.dtype(x.dtype).itemsize
    out_itemsize = jnp.dtype(out_dtype).itemsize
    row_align = 8 if x_itemsize >= 4 else (16 if x_itemsize == 2 else 32)

    # ---- generation-aware VMEM budget (kron double-buffer included) -----------
    try:
        vmem_cap = int(pltpu.get_tpu_info().vmem_capacity_bytes)
    except Exception:
        vmem_cap = 64 * 1024 * 1024           # conservative (v7x per-TC physical)
    budget = min(vmem_cap // 2, 40 * 1024 * 1024)
    kron_bytes = folded_in * folded_out * jnp.dtype(k_dtype).itemsize
    bytes_per_row = folded_in * x_itemsize + folded_out * out_itemsize
    max_bt = (budget - 2 * kron_bytes) // (2 * bytes_per_row)
    max_bt = max(row_align, (max_bt // row_align) * row_align)

    outputs = []
    if rows > 0:
        # balanced tile size; >=2 grid steps so ("parallel",) uses both v7x TCs
        tile_cap = max(row_align, min(batch_tile, max_bt))
        num_steps = max(1, pl.cdiv(rows, tile_cap))
        if num_steps < 2 and rows >= 2 * row_align:
            num_steps = 2
        bt = row_align * pl.cdiv(pl.cdiv(rows, num_steps), row_align)
        bt = max(row_align, min(bt, max_bt))
        grid = pl.cdiv(rows, bt)              # last block may be ragged (masked)

        x_body = x if body_batch == batch else x[:body_batch]
        xf = x_body.reshape(rows, folded_in)  # free contiguous reshape

        cost = pl.CostEstimate(
            flops=2 * rows * folded_in * folded_out,
            transcendentals=0,
            bytes_accessed=rows * bytes_per_row + kron_bytes,
        )

        body_out = pl.pallas_call(
            _dd_matmul_kernel,
            out_shape=jax.ShapeDtypeStruct((rows, folded_out), out_dtype),
            grid=(grid,),
            in_specs=[
                # one lane-dense batch tile per grid step
                pl.BlockSpec((bt, folded_in), lambda i: (i, 0)),
                # kron matrix: constant block index -> fetched once, resident
                pl.BlockSpec((folded_in, folded_out), lambda i: (0, 0)),
            ],
            out_specs=pl.BlockSpec((bt, folded_out), lambda i: (i, 0)),
            compiler_params=pltpu.CompilerParams(
                dimension_semantics=("parallel",),
                vmem_limit_bytes=int(budget + 2 * 1024 * 1024),
            ),
            cost_estimate=cost,
        )(xf, kron_big)

        outputs.append(body_out.reshape(body_batch, q_num))  # free unfold

    if tail > 0:
        # tiny remainder (< fold rows): negligible plain-JAX matmul
        tail_out = jnp.dot(
            x[body_batch:].astype(jnp.float32), kron_small,
            preferred_element_type=jnp.float32).astype(out_dtype)
        outputs.append(tail_out)

    if len(outputs) == 1:
        return outputs[0]
    return jnp.concatenate(outputs, axis=0)


def _reference(x, weights, q_num):
    sw = jax.nn.softmax(weights.astype(jnp.float32), axis=0)  # (agent_num, 1)
    kron = jnp.kron(sw, jnp.eye(q_num, dtype=jnp.float32))    # (agent_num*q, q)
    return x.astype(jnp.float32) @ kron


if __name__ == "__main__":
    key = jax.random.PRNGKey(0)
    k_x, k_w = jax.random.split(key)

    # module hyperparameters implied by forward():
    #   out_dim (q_num) = 8, agent_num = input_dim / out_dim = 4 -> input_dim = 32
    agent_num = 4
    q_num = 8
    input_dim = agent_num * q_num
    batch = 1000   # not a multiple of fold=16 -> exercises tail + ragged block

    x = jax.random.normal(k_x, (batch, input_dim), dtype=jnp.float32)
    # self.weights = nn.Parameter(T.randn(agent_num, 1)) -> deterministic init here
    weights = jax.random.normal(k_w, (agent_num, 1), dtype=jnp.float32)

    # small batch_tile only so the demo exercises a multi-step grid + ragged
    # final block (real workloads should keep the default 2048 folded rows).
    out = total_distribution_decompose_forward(
        x, weights, agent_num=agent_num, q_num=q_num, batch_tile=16)
    out = jax.block_until_ready(out)

    ref = _reference(x, weights, q_num)
    assert out.shape == (batch, q_num)
    assert jnp.allclose(out, ref, atol=1e-5, rtol=1e-5), "mismatch vs reference"

    print("KERNEL_OK")
</pallas_src>

<mosaic_0001>
module attributes {stable_mosaic.version = 11 : i64} {
  func.func @_dd_matmul_kernel(%arg0: i32, %arg1: memref<16x512xf32, #tpu.memory_space<vmem>>, %arg2: memref<512x128xf32, #tpu.memory_space<vmem>>, %arg3: memref<16x128xf32, #tpu.memory_space<vmem>>) attributes {dimension_semantics = [#tpu.dimension_semantics<parallel>], iteration_bounds = array<i64: 4>, scalar_prefetch = 0 : i64, scratch_operands = 0 : i64, tpu.core_type = #tpu.core_type<tc>, window_params = [{transform_indices = @transform_0, window_bounds = array<i64: 16, 512>}, {pipeline_mode = #tpu.pipeline_mode<synchronous>, transform_indices = @transform_1, window_bounds = array<i64: 512, 128>}, {transform_indices = @transform_2, window_bounds = array<i64: 16, 128>}]} {
    %c0 = arith.constant 0 : index
    %c0_0 = arith.constant 0 : index
    %0 = vector.load %arg1[%c0, %c0_0] : memref<16x512xf32, #tpu.memory_space<vmem>>, vector<16x512xf32>
    %c0_1 = arith.constant 0 : index
    %c0_2 = arith.constant 0 : index
    %1 = vector.load %arg2[%c0_1, %c0_2] : memref<512x128xf32, #tpu.memory_space<vmem>>, vector<512x128xf32>
    %cst = arith.constant dense<0.000000e+00> : vector<16x128xf32>
    %2 = tpu.matmul %0, %1, %cst {dimension_numbers = #tpu.dot_dimension_numbers<[1], [0], [0], [1], [0, 0, 1, 1], [], []>} : vector<16x512xf32>, vector<512x128xf32>, vector<16x128xf32> -> vector<16x128xf32>
    %c0_3 = arith.constant 0 : index
    %c0_4 = arith.constant 0 : index
    %3 = vector.load %arg3[%c0_3, %c0_4] : memref<16x128xf32, #tpu.memory_space<vmem>>, vector<16x128xf32>
    tpu.vector_store %arg3[%c0_3, %c0_4], %2 {strides = array<i32>} : memref<16x128xf32, #tpu.memory_space<vmem>>, vector<16x128xf32>,
    return
  }
  func.func @transform_0(%arg0: i32) -> (i32, i32) {
    %c0_i32 = arith.constant 0 : i32
    %c0_i32_0 = arith.constant 0 : i32
    return %arg0, %c0_i32 : i32, i32
  }
  func.func @transform_1(%arg0: i32) -> (i32, i32) {
    %c0_i32 = arith.constant 0 : i32
    %c0_i32_0 = arith.constant 0 : i32
    %c0_i32_1 = arith.constant 0 : i32
    return %c0_i32, %c0_i32_0 : i32, i32
  }
  func.func @transform_2(%arg0: i32) -> (i32, i32) {
    %c0_i32 = arith.constant 0 : i32
    %c0_i32_0 = arith.constant 0 : i32
    return %arg0, %c0_i32 : i32, i32
  }
}

</mosaic_0001>

<bundles_post_ra>
// kernel: tpu_custom_call.1
= control target key start
LH: loop header
LB: loop body
LE: loop exit
PB: predicated region body
PF: predicated region fallthrough
CT: control target
= control target key end

     0   :  { %7 = vsyncpa [#allocation3], 0  ;;  %s994_s0 = inlined_call_operand.hbm [shape: f32[62,512], index: 0, kind: input, shape index: {}]   ;;  %s995_s1 = inlined_call_operand.hbm [shape: f32[512,128], index: 1, kind: input, shape index: {}]   ;;  %s996_s2 = inlined_call_operand.hbm [shape: f32[62,128], index: 2, kind: output, shape index: {}]  }
   0x1   :  { %9 = vsyncpa [#allocation3 + $0x1], 0 }
   0x2   :  { %10 = vsyncpa [#allocation6], 0 }
   0x3   :  { %11 = vsyncpa [#allocation4], 0 }
   0x4   :  { %13 = vsyncpa [#allocation4 + $0x1], 0  ;;  %s808_s9 = smov 0   ;;  %s810_s10 = smov 0  }
   0x5   :  { %s812_s11 = smov 0   ;;  %s814_s12 = smov 0  }
   0x6 LB: > { %s829_s13 = sadd.s32 4294967295, %s782_s12   ;;  %s501_s14 = sadd.s32 4294967294, %s782_s12   ;;  %s782_s12 = sphi %s814_s12, %s1017_s12   ;;  %s778_s11 = sphi %s812_s11, %s1016_s11   ;;  %s774_s10 = sphi %s810_s10, %s1015_s10   ;;  %s770_s9 = sphi %s808_s9, %s1014_s9  }
   0x7   : > { %p39_p0 = scmp.ne.s32.totalorder %s774_s10, %s770_s9  ;;  %p997_p1 = scmp.eq.s32.totalorder %s829_s13, 0 }
   0x8   : > { %p90_p3 = scmp.eq.s32.totalorder %s501_s14, 3  ;;  %p502_p5 = scmp.ge.s32.totalorder %s782_s12, 1 }
   0x9   : > { %p838_p4 = por %p997_p1, %p39_p0  ;;  %p97_p7 = scmp.lt.s32.totalorder %s782_s12, 5 }
   0xa   : > { %p843_p6 = por %p90_p3, %p39_p0  ;;  %s784_s18 = smov [#allocation5]  }
   0xb   : > { %s1001_s15 = scalar_select %p838_p4, 1, 0 }
   0xc   : > { %s1002_s16 = scalar_select %p843_p6, 1, 0 }
   0xd   : > { %p848_p8 = pnand %p502_p5, %p97_p7  ;;  %s109_s19 = sshll.u32 %s784_s18, 4  ;;  %s110_s19 = int_to_ptr.vmem [resolvable:$true] %s109_s19 }
   0xe   : > { %s861_s21 = sadd.s32 1, %s782_s12   ;;  %s26_s22 = sadd.s32 1, %s778_s11 }
   0xf   : > { %s1003_s17 = scalar_select %p848_p8, 1, 0 }
  0x10   : > { %p605_p9 = pneg %p848_p8  ;;  %s23_s23 = ssub.s32 %s782_s12, %s861_s21 }
  0x11   : > { %s671_s24 = scalar_lea.vmem %s110_s19, 8192  ;;  %p679_p3 = scmp.lt.s32.totalorder %s110_s19, %s110_s19 }
  0x12   : > { %p856_p10 = pnand %p605_p9, %p997_p1  ;;  %p672_p12 = scmp.ne.s32.totalorder %s110_s19, %s671_s24 }
  0x13   : > { %p680_p5 = scmp.lt.s32.totalorder %s671_s24, %s671_s24 }
  0x14   : > { %p662_p11 = pneg %p856_p10 }
  0x15   : > { %p681_p7 = por %p680_p5, %p679_p3 }
  0x16   : > { %p674_p13 = pnand %p672_p12, %p662_p11 }
  0x18   : > { %p675_p0 = pneg %p674_p13 }
  0x1a   : > { %p682_p2 = pnand %p681_p7, %p675_p0 }
  0x1c   : > { %685 = shalt.err (!%p682_p2)
}
  0x1d   : > { %s785_s25 = smov 128   ;;  %s786_s26 = smov 8  }
  0x1e   : > { %608 = dma.hbm_to_vmem [thread:$0]  (!%p856_p10), %s995_s1, 8192, %s110_s19, [#allocation6], %s785_s25, %s785_s25, %s786_s26  }
  0x1f   : > { %p24_p9 = scmp.eq.s32.totalorder %s23_s23, 0  ;;  %p33_p11 = scmp.ne.s32.totalorder %s778_s11, %s774_s10 }
  0x20   : > { %p34_p12 = scmp.eq.s32.totalorder %s782_s12, 0  ;;  %p618_p2 = scmp.lt.s32.totalorder %s782_s12, 4 }
  0x21   : > { %s878_s29 = scalar_select %p24_p9, %s778_s11, %s26_s22  }
  0x22   : > { %p35_p13 = por %p34_p12, %p33_p11  ;;  %p1005_p0 = scmp.eq.s32.totalorder %s829_s13, 3 }
  0x23   : > { %s123_s3 = sand.u32 1, %s778_s11   ;;  %s519_s4 = sshll.u32 %s782_s12, 10 }
  0x24   : > { %p882_p3 = por %p1005_p0, %p33_p11  ;;  %s505_s5 = sshll.u32 %s123_s3, 6 }
  0x25   : > { %s891_s8 = scalar_lea.hbm %s994_s0, %s519_s4  ;;  %s127_s14 = scalar_lea.vmem [#allocation2], %s505_s5 }
  0x26   : > { %s1006_s30 = scalar_select %p882_p3, 1, 0 }
  0x27   : > { %s135_s18 = sshll.u32 %s127_s14, 4  ;;  %p893_p10 = pnand %p618_p2, %p35_p13  ;;  %s897_s18 = int_to_ptr.vmem [resolvable:$true] %s135_s18 }
  0x28   : > { %s899_s20 = scalar_lea.sflag [#allocation3], %s123_s3  ;;  %s686_s22 = scalar_lea.hbm %s891_s8, 1024 }
  0x29   : > { %p687_p5 = scmp.ne.s32.totalorder %s891_s8, %s686_s22  ;;  %p688_p7 = pneg %p893_p10 }
  0x2a   : > { %s691_s25 = scalar_lea.hbm %s994_s0, 4096  ;;  %p692_p12 = scmp.lt.s32.totalorder %s891_s8, %s994_s0 }
  0x2b   : > { %p689_p9 = pnand %p688_p7, %p687_p5  ;;  %p693_p2 = scmp.lt.s32.totalorder %s691_s25, %s686_s22 }
  0x2d   : > { %p690_p11 = pneg %p689_p9  ;;  %p694_p13 = por %p693_p2, %p692_p12 }
  0x2f   : > { %p695_p0 = pnand %p694_p13, %p690_p11 }
  0x31   : > { %698 = shalt.err (!%p695_p0)
}
  0x32   : > { %s699_s28 = scalar_lea.vmem %s897_s18, 1024  ;;  %s787_s3 = smov [#allocation2]  }
  0x33   : > { %p700_p1 = scmp.ne.s32.totalorder %s897_s18, %s699_s28  ;;  %s704_s4 = sshll.u32 %s787_s3, 4  ;;  %s705_s4 = int_to_ptr.vmem [resolvable:$false] %s704_s4 }
  0x34   : > { %s706_s5 = scalar_lea.vmem %s705_s4, 2048  ;;  %p707_p9 = scmp.lt.s32.totalorder %s897_s18, %s705_s4 }
  0x35   : > { %p702_p6 = pnand %p700_p1, %p688_p7  ;;  %p708_p3 = scmp.lt.s32.totalorder %s706_s5, %s699_s28 }
  0x37   : > { %p703_p5 = pneg %p702_p6  ;;  %p709_p4 = por %p708_p3, %p707_p9 }
  0x39   : > { %p710_p8 = pnand %p709_p4, %p703_p5 }
  0x3b   : > { %713 = shalt.err (!%p710_p8)
}
  0x3c   : > { %s788_s6 = smov 512   ;;  %s789_s7 = smov 32  }
  0x3d   : > { %612 = dma.hbm_to_vmem [thread:$0]  (!%p893_p10), %s891_s8, 1024, %s897_s18, %s899_s20, %s788_s6, %s788_s6, %s789_s7  }
  0x3e   : > { %p1008_p1 = scmp.ne.s32.totalorder %s1003_s17, 0 }
  0x3f   : > { %s923_s14 = sand.u32 (!%p1008_p1), 1, %s774_s10   ;;  %p1009_p4 = scmp.ne.s32.totalorder (!%p1008_p1), %s1001_s15, 0 }
  0x40   : > { %147 = sbr.rel (%p1008_p1) target bundleno = 326 (0x146), region = 28  ;;  %s510_s22 = sshll.u32 (!%p1008_p1), %s923_s14, 6 }
  0x41   : > { %s150_s23 = scalar_lea.sflag (!%p1008_p1), [#allocation3], %s923_s14  ;;  %s927_s24 = scalar_lea.vmem (!%p1008_p1), [#allocation2], %s510_s22 }
  0x45   : > { %757 = dma.done.wait (%p1009_p4), %s150_s23, 1024  }
  0x46   : > { %759 = vsyncadd (%p1009_p4), %s150_s23, 4294966272  ;;  %p1010_p6 = scmp.eq.s32.totalorder %s829_s13, 0 }
  0x48   : > { %761 = dma.done.wait (%p1010_p6), [#allocation6], 8192   ;;  %p1011_p8 = pmov %p1010_p6 }
  0x49   : > { %v219_v0 = vld [vmem:[#allocation5 + $0xf8] sm:$0xff]  ;;  %v218_v4 = vld [vmem:[#allocation5 + $0xf0] sm:$0xff]  ;;  %v217_v8 = vld [vmem:[#allocation5 + $0xe8] sm:$0xff]  ;;  %s512_s15 = sshll.u32 %s923_s14, 4  ;;  %s520_s18 = sshll.u32 %s829_s13, 8 }
  0x4a   : > { %763 = vsyncadd (%p1011_p8), [#allocation6], 4294959104  ;;  %v251_v1 = vld [vmem:[#allocation5 + $0x1f8] sm:$0xff]  ;;  %521 = vmatprep.subr.mxu0 %v219_v0  ;;  %v250_v5 = vld [vmem:[#allocation5 + $0x1f0] sm:$0xff]  ;;  %s177_s17 = scalar_lea.vmem [#allocation7], %s512_s15  ;;  %s952_s25 = scalar_lea.hbm %s996_s2, %s520_s18 }
  0x4b   : > { %v203_v2 = vld [vmem:[#allocation5 + $0x78] sm:$0xff]  ;;  %559 = vmatprep.subr.mxu1 %v251_v1  ;;  %v202_v6 = vld [vmem:[#allocation5 + $0x70] sm:$0xff]  ;;  %v249_v9 = vld [vmem:[#allocation5 + $0x1e8] sm:$0xff]  ;;  %s418_s8 = sshll.u32 %s177_s17, 4  ;;  %s405_s26 = scalar_lea.sflag [#allocation4], %s923_s14  ;;  %s947_s8 = int_to_ptr.vmem [resolvable:$true] %s418_s8 }
  0x4c   : > { %v235_v3 = vld [vmem:[#allocation5 + $0x178] sm:$0xff]  ;;  %522 = vmatpush3.msra.mxu0 %v203_v2  ;;  %v234_v7 = vld [vmem:[#allocation5 + $0x170] sm:$0xff]  ;;  %v201_v10 = vld [vmem:[#allocation5 + $0x68] sm:$0xff]  ;;  %s714_s27 = scalar_lea.vmem %s947_s8, 256  ;;  %p1012_p10 = scmp.ne.s32.totalorder %s1006_s30, 0 }
  0x4d   : > { %560 = vmatpush3.msra.mxu1 %v235_v3  ;;  %523 = vmatprep.subr.mxu0 %v218_v4  ;;  %v233_v11 = vld [vmem:[#allocation5 + $0x168] sm:$0xff]  ;;  %v216_v12 = vld [vmem:[#allocation5 + $0xe0] sm:$0xff]  ;;  %v215_v16 = vld [vmem:[#allocation5 + $0xd8] sm:$0xff]  ;;  %p715_p3 = scmp.ne.s32.totalorder %s947_s8, %s714_s27  ;;  %s790_s13 = smov [#allocation7]  }
  0x4e   : > { %561 = vmatprep.subr.mxu1 %v250_v5  ;;  %524 = vmatpush3.msra.mxu0 %v202_v6  ;;  %v248_v13 = vld [vmem:[#allocation5 + $0x1e0] sm:$0xff]  ;;  %v247_v17 = vld [vmem:[#allocation5 + $0x1d8] sm:$0xff]  ;;  %v214_v20 = vld [vmem:[#allocation5 + $0xd0] sm:$0xff]  ;;  %s718_s28 = sshll.u32 %s790_s13, 4  ;;  %s719_s28 = int_to_ptr.vmem [resolvable:$false] %s718_s28 }
  0x4f   : > { %562 = vmatpush3.msra.mxu1 %v234_v7  ;;  %525 = vmatprep.subr.mxu0 %v217_v8  ;;  %v200_v14 = vld [vmem:[#allocation5 + $0x60] sm:$0xff]  ;;  %v199_v18 = vld [vmem:[#allocation5 + $0x58] sm:$0xff]  ;;  %v246_v21 = vld [vmem:[#allocation5 + $0x1d0] sm:$0xff]  ;;  %p716_p7 = pnand %p715_p3, %p1012_p10  ;;  %s720_s3 = scalar_lea.vmem %s719_s28, 512 }
  0x50   : > { %563 = vmatprep.subr.mxu1 %v249_v9  ;;  %v232_v15 = vld [vmem:[#allocation5 + $0x160] sm:$0xff]  ;;  %526 = vmatpush3.msra.mxu0 %v201_v10  ;;  %v231_v19 = vld [vmem:[#allocation5 + $0x158] sm:$0xff]  ;;  %v198_v22 = vld [vmem:[#allocation5 + $0x50] sm:$0xff]  ;;  %p721_p12 = scmp.lt.s32.totalorder %s947_s8, %s719_s28  ;;  %p722_p2 = scmp.lt.s32.totalorder %s720_s3, %s714_s27 }
  0x51   : > { %564 = vmatpush3.msra.mxu1 %v233_v11  ;;  %527 = vmatprep.subr.mxu0 %v216_v12  ;;  %v230_v23 = vld [vmem:[#allocation5 + $0x150] sm:$0xff]  ;;  %v213_v24 = vld [vmem:[#allocation5 + $0xc8] sm:$0xff]  ;;  %v212_v28 = vld [vmem:[#allocation5 + $0xc0] sm:$0xff]  ;;  %p717_p11 = pneg %p716_p7 }
  0x52   : > { %565 = vmatprep.subr.mxu1 %v248_v13  ;;  %528 = vmatpush3.msra.mxu0 %v200_v14  ;;  %v245_v25 = vld [vmem:[#allocation5 + $0x1c8] sm:$0xff]  ;;  %v244_v29 = vld [vmem:[#allocation5 + $0x1c0] sm:$0xff]  ;;  %v211_v32 = vld [vmem:[#allocation5 + $0xb8] sm:$0xff]  ;;  %p723_p13 = por %p722_p2, %p721_p12 }
  0x53   : > { %566 = vmatpush3.msra.mxu1 %v232_v15  ;;  %529 = vmatprep.subr.mxu0 %v215_v16  ;;  %v197_v26 = vld [vmem:[#allocation5 + $0x48] sm:$0xff]  ;;  %v196_v30 = vld [vmem:[#allocation5 + $0x40] sm:$0xff]  ;;  %v243_v33 = vld [vmem:[#allocation5 + $0x1b8] sm:$0xff] }
  0x54   : > { %567 = vmatprep.subr.mxu1 %v247_v17  ;;  %530 = vmatpush3.msra.mxu0 %v199_v18  ;;  %v229_v27 = vld [vmem:[#allocation5 + $0x148] sm:$0xff]  ;;  %v228_v31 = vld [vmem:[#allocation5 + $0x140] sm:$0xff]  ;;  %v195_v34 = vld [vmem:[#allocation5 + $0x38] sm:$0xff]  ;;  %p724_p0 = pnand %p723_p13, %p717_p11 }
  0x55   : > { %568 = vmatpush3.msra.mxu1 %v231_v19  ;;  %531 = vmatprep.subr.mxu0 %v214_v20  ;;  %v227_v35 = vld [vmem:[#allocation5 + $0x138] sm:$0xff]  ;;  %v210_v36 = vld [vmem:[#allocation5 + $0xb0] sm:$0xff]  ;;  %v209_v40 = vld [vmem:[#allocation5 + $0xa8] sm:$0xff] }
  0x56   : > { %569 = vmatprep.subr.mxu1 %v246_v21  ;;  %532 = vmatpush3.msra.mxu0 %v198_v22  ;;  %v242_v37 = vld [vmem:[#allocation5 + $0x1b0] sm:$0xff]  ;;  %v241_v41 = vld [vmem:[#allocation5 + $0x1a8] sm:$0xff]  ;;  %v208_v44 = vld [vmem:[#allocation5 + $0xa0] sm:$0xff] }
  0x57   : > { %570 = vmatpush3.msra.mxu1 %v230_v23  ;;  %533 = vmatprep.subr.mxu0 %v213_v24  ;;  %v194_v38 = vld [vmem:[#allocation5 + $0x30] sm:$0xff]  ;;  %v193_v42 = vld [vmem:[#allocation5 + $0x28] sm:$0xff]  ;;  %v240_v45 = vld [vmem:[#allocation5 + $0x1a0] sm:$0xff] }
  0x58   : > { %571 = vmatprep.subr.mxu1 %v245_v25  ;;  %534 = vmatpush3.msra.mxu0 %v197_v26  ;;  %v226_v39 = vld [vmem:[#allocation5 + $0x130] sm:$0xff]  ;;  %v225_v43 = vld [vmem:[#allocation5 + $0x128] sm:$0xff]  ;;  %v192_v46 = vld [vmem:[#allocation5 + $0x20] sm:$0xff] }
  0x59   : > { %572 = vmatpush3.msra.mxu1 %v229_v27  ;;  %535 = vmatprep.subr.mxu0 %v212_v28  ;;  %v224_v47 = vld [vmem:[#allocation5 + $0x120] sm:$0xff]  ;;  %v207_v48 = vld [vmem:[#allocation5 + $0x98] sm:$0xff]  ;;  %v206_v52 = vld [vmem:[#allocation5 + $0x90] sm:$0xff] }
  0x5a   : > { %573 = vmatprep.subr.mxu1 %v244_v29  ;;  %536 = vmatpush3.msra.mxu0 %v196_v30  ;;  %v239_v49 = vld [vmem:[#allocation5 + $0x198] sm:$0xff]  ;;  %v238_v53 = vld [vmem:[#allocation5 + $0x190] sm:$0xff]  ;;  %v205_v56 = vld [vmem:[#allocation5 + $0x88] sm:$0xff] }
  0x5b   : > { %574 = vmatpush3.msra.mxu1 %v228_v31  ;;  %537 = vmatprep.subr.mxu0 %v211_v32  ;;  %v191_v50 = vld [vmem:[#allocation5 + $0x18] sm:$0xff]  ;;  %v190_v54 = vld [vmem:[#allocation5 + $0x10] sm:$0xff]  ;;  %v237_v57 = vld [vmem:[#allocation5 + $0x188] sm:$0xff] }
  0x5c   : > { %575 = vmatprep.subr.mxu1 %v243_v33  ;;  %538 = vmatpush3.msra.mxu0 %v195_v34  ;;  %v223_v51 = vld [vmem:[#allocation5 + $0x118] sm:$0xff]  ;;  %v222_v55 = vld [vmem:[#allocation5 + $0x110] sm:$0xff]  ;;  %v189_v58 = vld [vmem:[#allocation5 + $0x8] sm:$0xff] }
  0x5d   : > { %576 = vmatpush3.msra.mxu1 %v227_v35  ;;  %539 = vmatprep.subr.mxu0 %v210_v36  ;;  %v221_v59 = vld [vmem:[#allocation5 + $0x108] sm:$0xff]  ;;  %v204_v60 = vld [vmem:[#allocation5 + $0x80] sm:$0xff]  ;;  %v183_v1 = vld [vmem:[%s927_s24 + $0x18] sm:$0xff] }
  0x5e   : > { %577 = vmatprep.subr.mxu1 %v242_v37  ;;  %540 = vmatpush3.msra.mxu0 %v194_v38  ;;  %v236_v61 = vld [vmem:[#allocation5 + $0x180] sm:$0xff]  ;;  %v181_v63 = vld [vmem:[%s927_s24 + $0x8] sm:$0xff]  ;;  %v182_v3 = vld [vmem:[%s927_s24 + $0x10] sm:$0xff] }
  0x5f   : > { %578 = vmatpush3.msra.mxu1 %v226_v39  ;;  %541 = vmatprep.subr.mxu0 %v209_v40  ;;  %v188_v62 = vld [vmem:[#allocation5] sm:$0xff]  ;;  %v185_v4 = vld [vmem:[%s927_s24 + $0x28] sm:$0xff]  ;;  %v187_v5 = vld [vmem:[%s927_s24 + $0x38] sm:$0xff] }
  0x60   : > { %579 = vmatprep.subr.mxu1 %v241_v41  ;;  %542 = vmatpush3.msra.mxu0 %v193_v42  ;;  %v220_v0 = vld [vmem:[#allocation5 + $0x100] sm:$0xff]  ;;  %v186_v7 = vld [vmem:[%s927_s24 + $0x30] sm:$0xff] }
  0x61   : > { %580 = vmatpush3.msra.mxu1 %v225_v43  ;;  %543 = vmatprep.subr.mxu0 %v208_v44  ;;  %v180_v2 = vld [vmem:[%s927_s24] sm:$0xff] }
  0x62   : > { %581 = vmatprep.subr.mxu1 %v240_v45  ;;  %544 = vmatpush3.msra.mxu0 %v192_v46  ;;  %v184_v6 = vld [vmem:[%s927_s24 + $0x20] sm:$0xff] }
  0x63   : > { %582 = vmatpush3.msra.mxu1 %v224_v47  ;;  %545 = vmatprep.subr.mxu0 %v207_v48 }
  0x64   : > { %583 = vmatprep.subr.mxu1 %v239_v49  ;;  %546 = vmatpush3.msra.mxu0 %v191_v50 }
  0x65   : > { %584 = vmatpush3.msra.mxu1 %v223_v51  ;;  %547 = vmatprep.subr.mxu0 %v206_v52 }
  0x66   : > { %585 = vmatprep.subr.mxu1 %v238_v53  ;;  %548 = vmatpush3.msra.mxu0 %v190_v54 }
  0x67   : > { %586 = vmatpush3.msra.mxu1 %v222_v55  ;;  %549 = vmatprep.subr.mxu0 %v205_v56 }
  0x68   : > { %587 = vmatprep.subr.mxu1 %v237_v57  ;;  %550 = vmatpush3.msra.mxu0 %v189_v58 }
  0x69   : > { %588 = vmatpush3.msra.mxu1 %v221_v59  ;;  %551 = vmatprep.subr.mxu0 %v204_v60 }
  0x6a   : > { %589 = vmatprep.subr.mxu1 %v236_v61  ;;  %552 = vmatpush3.msra.mxu0 %v188_v62 }
  0x6b   : > { %316 = vmatprep.mubr.f32.mxu0 %v181_v63  ;;  %590 = vmatpush3.msra.mxu1 %v220_v0 }
  0x6c   : > { %391 = vmatprep.mubr.f32.mxu1 %v183_v1  ;;  %317 = vmatmul.mubr.f32.vlgmr.msra.gmra.mxu0 %v180_v2 }
  0x6d   : > { %392 = vmatmul.mubr.f32.vlgmr.msra.gmra.mxu1 %v182_v3  ;;  %321 = vmatprep.mubr.f32.mxu0 %v185_v4 }
  0x6e   : > { %396 = vmatprep.mubr.f32.mxu1 %v187_v5 }
  0x70   : > { %322 = vmatmul.mubr.f32.gmra.mxu0 %v184_v6 }
  0x71   : > { %397 = vmatmul.mubr.f32.gmra.mxu1 %v186_v7 }
 0x12c   : > { %v553_v8 = vpop.f32.mrf.mxu0 }
 0x12d   : > { %v591_v9 = vpop.f32.mrf.mxu1 }
 0x12e   : > { %v554_v10 = vpop.f32.mrf.mxu0 }
 0x12f   : > { %v592_v11 = vpop.f32.mrf.mxu1  ;;  %v555_v12 = vadd.f32 %v554_v10, %v553_v8 }
 0x130   : > { %v593_v13 = vadd.f32 %v592_v11, %v591_v9  ;;  %v556_v14 = vpop.f32.mrf.mxu0 }
 0x131   : > { %v594_v15 = vpop.f32.mrf.mxu1 }
 0x132   : > { %v394_v16 = vadd.f32 %v593_v13, %v555_v12  ;;  %v557_v17 = vpop.f32.mrf.mxu0 }
 0x133   : > { %v595_v18 = vpop.f32.mrf.mxu1  ;;  %v558_v19 = vadd.f32 %v557_v17, %v556_v14 }
 0x134   : > { %402 = vst [vmem:[%s177_s17] sm:$0xff] %v394_v16  ;;  %v596_v20 = vadd.f32 %v595_v18, %v594_v15 }
 0x136   : > { %v399_v21 = vadd.f32 %v596_v20, %v558_v19 }
 0x138   : > { %403 = vst [vmem:[%s177_s17 + $0x8] sm:$0xff] %v399_v21 }
 0x139   : > { %727 = shalt.err (!%p724_p0)
}
 0x13a   : > { %s728_s4 = scalar_lea.hbm %s952_s25, 256  ;;  %s732_s7 = scalar_lea.hbm %s996_s2, 1024 }
 0x13b   : > { %p729_p5 = scmp.ne.s32.totalorder %s952_s25, %s728_s4  ;;  %p733_p4 = scmp.lt.s32.totalorder %s952_s25, %s996_s2 }
 0x13c   : > { %p734_p6 = scmp.lt.s32.totalorder %s732_s7, %s728_s4 }
 0x13d   : > { %p730_p9 = pnand %p729_p5, %p1012_p10 }
 0x13e   : > { %p735_p8 = por %p734_p6, %p733_p4 }
 0x13f   : > { %p731_p1 = pneg %p730_p9 }
 0x141   : > { %p736_p3 = pnand %p735_p8, %p731_p1 }
 0x143   : > { %739 = shalt.err (!%p736_p3)
}
 0x144   : > { %s791_s24 = smov 128   ;;  %s792_s15 = smov 8  }
 0x145   : > { %603 = dma.vmem_to_hbm [thread:$0]  (%p1012_p10), %s947_s8, 256, %s952_s25, %s405_s26, %s791_s24, %s791_s24, %s792_s15  }
 0x146 PF: > { %p620_p7 = scmp.ge.s32.totalorder %s782_s12, 2  ;;  %s433_s17 = sand.u32 1, %s770_s9  }
 0x147   : > { %p1013_p11 = scmp.ne.s32.totalorder %s1002_s16, 0  ;;  %s434_s18 = scalar_lea.sflag [#allocation4], %s433_s17 }
 0x149   : > { %p614_p12 = pnand %p620_p7, %p1013_p11 }
 0x14b   : > { %p615_p2 = pneg %p614_p12 }
 0x14d   : > { %765 = dma.done.wait (%p615_p2), %s434_s18, 256  }
 0x14e   : > { %767 = vsyncadd (%p615_p2), %s434_s18, 4294967040  ;;  %p16_p13 = scmp.ge.s32.totalorder %s861_s21, 6   ;;  %s1014_s9 = smov %s774_s10 }
 0x14f   : > { %s1015_s10 = smov %s778_s11  ;;  %s1016_s11 = smov %s878_s29 }
 0x150   : > { %s1017_s12 = smov %s861_s21  ;;  %18 = sbr.rel (!%p16_p13) target bundleno = 6 (0x6), region = 77 }
 0x155   :  { %439 = vsyncpa [#allocation3], 1 }
 0x156   :  { %441 = vsyncpa [#allocation3 + $0x1], 1 }
 0x157   :  { %442 = vsyncpa [#allocation6], 1 }
 0x158   :  { %443 = vsyncpa [#allocation4], 1 }
 0x159   :  { %445 = vsyncpa [#allocation4 + $0x1], 1 }

</bundles_post_ra>
